<compile_context>
chip_gen: v6e
topology: v6e:2x2x1
jax: 0.10.0
libtpu: 0.0.40
codegen_flags: <defaults>
</compile_context>

<pallas_src>
import math
from functools import partial

import jax
import jax.numpy as jnp
from jax.experimental import pallas as pl
from jax.experimental.pallas import tpu as pltpu


# ----------------------------------------------------------------------------
# Pallas kernel: fused linear + epilogue
# ----------------------------------------------------------------------------
def _linear_act_kernel(x_ref, w_ref, b_ref, o_ref, *,
                       use_softmax, use_abs, use_softplus):
    # x_ref: (TM, Din) f32 -> cast to bf16 on the VPU (cheap) so the MXU runs bf16.
    xb = x_ref[...].astype(jnp.bfloat16)
    # (TM, Din) bf16 @ (Din, Dout) bf16 -> f32 accumulate on the MXU.
    acc = jnp.dot(xb, w_ref[...], preferred_element_type=jnp.float32)
    acc = acc + b_ref[...]                      # f32 per-channel bias

    if use_softmax:
        # Logical width is exactly Dout, so lane reductions need no explicit mask.
        m = jnp.max(acc, axis=-1, keepdims=True)
        e = jnp.exp(acc - m)
        denom = jnp.sum(e, axis=-1, keepdims=True)
        acc = e * pl.reciprocal(denom, approx=True)   # divide on the EUP slot

    if use_abs:
        acc = jnp.abs(acc)

    if use_softplus:
        # torch.nn.functional.softplus (beta=1, threshold=20)
        acc = jnp.where(acc > 20.0, acc, jnp.log1p(jnp.exp(jnp.minimum(acc, 20.0))))

    o_ref[...] = acc.astype(o_ref.dtype)


# ----------------------------------------------------------------------------
# Wrappers
# ----------------------------------------------------------------------------
def _round_up(v, m):
    return ((v + m - 1) // m) * m


def _choose_tile_m(B):
    """Batch-row tile: big enough to amortize per-grid-step overhead and fill MXU rows,
    small enough to keep >= 2 grid steps (v7x dual-TensorCore) once B is non-trivial."""
    if B <= 8:
        return max(B, 1)                       # single tile, block dim == full array dim
    return min(512, _round_up(pl.cdiv(B, 2), 8))


def fold_params(w_out_in, bias):
    """Pre-fold PyTorch-layout Linear params once (outside jit).

    (Dout, Din) f32 weight -> transposed bf16 (Din, Dout); (Dout,) f32 bias -> (1, Dout).
    No lane padding needed: the kernel works on the logical Dout width directly.
    (If Dout ever grows large, pad/tile N in 256 multiples on v6e/v7x, 128 on v5e.)
    """
    w_kn = jnp.transpose(w_out_in).astype(jnp.bfloat16)
    b2 = bias.astype(jnp.float32).reshape(1, -1)
    return w_kn, b2


def linear_model_forward(x, w_kn, b2, *, softmax, abs_, softplus, tile_m=None):
    """out = flags(x @ W.T + b), computed by one fused Pallas kernel."""
    B, d_in = x.shape
    d_out = w_kn.shape[1]
    if tile_m is None:
        tile_m = _choose_tile_m(B)
    grid_m = pl.cdiv(B, tile_m)                # ragged last tile handled by Pallas

    kern = partial(_linear_act_kernel,
                   use_softmax=softmax, use_abs=abs_, use_softplus=softplus)

    # Resident weight/bias are double-buffered by the pipeline; raise the scoped VMEM
    # limit only when the folded weight actually needs it (v5e default is 16 MiB).
    resident_bytes = 2 * (d_in * d_out * 2 + d_out * 4)
    per_step_bytes = 2 * (tile_m * d_in * 4 + tile_m * d_out * 4)
    compiler_kwargs = dict(dimension_semantics=("parallel",))   # batch tiles -> both v7x TCs
    if resident_bytes + per_step_bytes > (12 << 20):
        compiler_kwargs["vmem_limit_bytes"] = min(
            _round_up(2 * (resident_bytes + per_step_bytes), 1 << 20), 48 << 20)

    out = pl.pallas_call(
        kern,
        out_shape=jax.ShapeDtypeStruct((B, d_out), jnp.float32),
        grid_spec=pltpu.PrefetchScalarGridSpec(
            num_scalar_prefetch=0,
            grid=(grid_m,),
            in_specs=[
                pl.BlockSpec((tile_m, d_in), lambda i: (i, 0)),   # batch-row tile (f32)
                pl.BlockSpec((d_in, d_out), lambda i: (0, 0)),    # whole weight, resident
                pl.BlockSpec((1, d_out), lambda i: (0, 0)),       # bias, resident
            ],
            out_specs=pl.BlockSpec((tile_m, d_out), lambda i: (i, 0)),  # exact-width store
        ),
        compiler_params=pltpu.CompilerParams(**compiler_kwargs),
    )(x, w_kn, b2)

    return out


# ----------------------------------------------------------------------------
# Main
# ----------------------------------------------------------------------------
if __name__ == "__main__":
    class Cfg:
        def __init__(self, softmax, abs_, softplus):
            self.input_dim = 32
            self.output_dim = 16
            self.softmax = softmax
            self.abs = abs_
            self.softplus = softplus

    key = jax.random.PRNGKey(0)
    kw, kb, kx = jax.random.split(key, 3)

    input_dim, output_dim, batch = 32, 16, 2
    # PyTorch nn.Linear default init: U(-1/sqrt(fan_in), 1/sqrt(fan_in))
    bound = 1.0 / math.sqrt(input_dim)
    w = jax.random.uniform(kw, (output_dim, input_dim), jnp.float32, -bound, bound)
    b = jax.random.uniform(kb, (output_dim,), jnp.float32, -bound, bound)
    x = jax.random.normal(kx, (batch, input_dim), jnp.float32)

    # Fold parameters once, outside jit (no per-forward transposes).
    w_kn, b2 = fold_params(w, b)

    # Exercise the module's flag combinations (Linear -> [softmax] -> [abs] -> [softplus]).
    configs = [Cfg(False, False, True),    # softplus head (original test config)
               Cfg(True, True, False),     # softmax + abs
               Cfg(False, False, False)]   # plain linear

    for cfg in configs:
        fwd = jax.jit(partial(linear_model_forward,
                              softmax=cfg.softmax, abs_=cfg.abs, softplus=cfg.softplus))
        out = jax.block_until_ready(fwd(x, w_kn, b2))

        # Pure-JAX f32 reference (tolerance accounts for bf16 MXU operands + approx recip).
        ref = x @ w.T + b
        if cfg.softmax:
            ref = jax.nn.softmax(ref, axis=1)
        if cfg.abs:
            ref = jnp.abs(ref)
        if cfg.softplus:
            ref = jnp.where(ref > 20.0, ref, jnp.log1p(jnp.exp(jnp.minimum(ref, 20.0))))

        assert out.shape == (batch, output_dim), out.shape
        assert out.dtype == jnp.float32
        assert bool(jnp.all(jnp.isfinite(out)))
        if cfg.softplus or cfg.softmax:
            assert bool(jnp.all(out >= 0.0))
        if cfg.softmax:
            assert bool(jnp.allclose(jnp.sum(out, axis=1), 1.0, atol=1e-2))
        assert bool(jnp.allclose(out, ref, rtol=5e-2, atol=3e-2)), (out, ref)

    print("KERNEL_OK")
</pallas_src>

<mosaic_0001>
module attributes {stable_mosaic.version = 11 : i64} {
  func.func @_linear_act_kernel(%arg0: i32, %arg1: memref<2x32xf32, #tpu.memory_space<vmem>>, %arg2: memref<32x16xbf16, #tpu.memory_space<vmem>>, %arg3: memref<1x16xf32, #tpu.memory_space<vmem>>, %arg4: memref<2x16xf32, #tpu.memory_space<vmem>>) attributes {dimension_semantics = [#tpu.dimension_semantics<parallel>], iteration_bounds = array<i64: 1>, scalar_prefetch = 0 : i64, scratch_operands = 0 : i64, tpu.core_type = #tpu.core_type<tc>, window_params = [{transform_indices = @transform_0, window_bounds = array<i64: 2, 32>}, {pipeline_mode = #tpu.pipeline_mode<synchronous>, transform_indices = @transform_1, window_bounds = array<i64: 32, 16>}, {pipeline_mode = #tpu.pipeline_mode<synchronous>, transform_indices = @transform_2, window_bounds = array<i64: 1, 16>}, {transform_indices = @transform_3, window_bounds = array<i64: 2, 16>}]} {
    %c0 = arith.constant 0 : index
    %c0_0 = arith.constant 0 : index
    %0 = vector.load %arg1[%c0, %c0_0] : memref<2x32xf32, #tpu.memory_space<vmem>>, vector<2x32xf32>
    %1 = arith.truncf %0 : vector<2x32xf32> to vector<2x32xbf16>
    %c0_1 = arith.constant 0 : index
    %c0_2 = arith.constant 0 : index
    %2 = vector.load %arg2[%c0_1, %c0_2] : memref<32x16xbf16, #tpu.memory_space<vmem>>, vector<32x16xbf16>
    %cst = arith.constant dense<0.000000e+00> : vector<2x16xf32>
    %3 = tpu.matmul %1, %2, %cst {dimension_numbers = #tpu.dot_dimension_numbers<[1], [0], [0], [1], [0, 0, 1, 1], [], []>} : vector<2x32xbf16>, vector<32x16xbf16>, vector<2x16xf32> -> vector<2x16xf32>
    %c0_3 = arith.constant 0 : index
    %c0_4 = arith.constant 0 : index
    %4 = vector.load %arg3[%c0_3, %c0_4] : memref<1x16xf32, #tpu.memory_space<vmem>>, vector<1x16xf32>
    %5 = vector.broadcast %4 : vector<1x16xf32> to vector<2x16xf32>
    %6 = arith.addf %3, %5 : vector<2x16xf32>
    %cst_5 = arith.constant 2.000000e+01 : f32
    %7 = vector.broadcast %cst_5 : f32 to vector<2x16xf32>
    %8 = arith.cmpf ogt, %6, %7 : vector<2x16xf32>
    %cst_6 = arith.constant 2.000000e+01 : f32
    %9 = vector.broadcast %cst_6 : f32 to vector<2x16xf32>
    %10 = arith.minimumf %6, %9 : vector<2x16xf32>
    %11 = math.exp %10 : vector<2x16xf32>
    %12 = math.log1p %11 : vector<2x16xf32>
    %13 = arith.select %8, %6, %12 : vector<2x16xi1>, vector<2x16xf32>
    %c0_7 = arith.constant 0 : index
    %c0_8 = arith.constant 0 : index
    %14 = vector.load %arg4[%c0_7, %c0_8] : memref<2x16xf32, #tpu.memory_space<vmem>>, vector<2x16xf32>
    tpu.vector_store %arg4[%c0_7, %c0_8], %13 {strides = array<i32>} : memref<2x16xf32, #tpu.memory_space<vmem>>, vector<2x16xf32>,
    return
  }
  func.func @transform_0(%arg0: i32) -> (i32, i32) {
    %c0_i32 = arith.constant 0 : i32
    %c0_i32_0 = arith.constant 0 : i32
    return %arg0, %c0_i32 : i32, i32
  }
  func.func @transform_1(%arg0: i32) -> (i32, i32) {
    %c0_i32 = arith.constant 0 : i32
    %c0_i32_0 = arith.constant 0 : i32
    %c0_i32_1 = arith.constant 0 : i32
    return %c0_i32, %c0_i32_0 : i32, i32
  }
  func.func @transform_2(%arg0: i32) -> (i32, i32) {
    %c0_i32 = arith.constant 0 : i32
    %c0_i32_0 = arith.constant 0 : i32
    %c0_i32_1 = arith.constant 0 : i32
    return %c0_i32, %c0_i32_0 : i32, i32
  }
  func.func @transform_3(%arg0: i32) -> (i32, i32) {
    %c0_i32 = arith.constant 0 : i32
    %c0_i32_0 = arith.constant 0 : i32
    return %arg0, %c0_i32 : i32, i32
  }
}

</mosaic_0001>

<bundles_post_ra>
// kernel: linear_model_forward.1
= control target key start
LH: loop header
LB: loop body
LE: loop exit
PB: predicated region body
PF: predicated region fallthrough
CT: control target
= control target key end

     0   :  { %v161_v1 = vmov 0.0   ;;  %vm162_vm0 = vmmov 0   ;;  %s199_s0 = inlined_call_operand.vmem [shape: f32[2,32], index: 0, kind: input, shape index: {}]   ;;  %s200_s1 = inlined_call_operand.vmem [shape: bf16[32,16], index: 1, kind: input, shape index: {}]   ;;  %s201_s2 = inlined_call_operand.vmem [shape: f32[1,16], index: 2, kind: input, shape index: {}]   ;;  %s202_s3 = inlined_call_operand.hbm [shape: f32[2,16], index: 3, kind: output, shape index: {}]  }
   0x1   :  { %v133_v0 = vld [vmem:[%s200_s1 + $0x8] sm:$0xff]   ;;  %122 = vmatprep.subr.bf16.mxu0 %v161_v1  ;;  %v134_v2 = vld [vmem:[%s200_s1] sm:$0xff]   ;;  %126 = vmatprep.mubr.msk.bf16.mxu0 %vm162_vm0, %v161_v1 }
   0x2   :  { %123 = vmatpush3.bf16.msra.mxu0 %v133_v0  ;;  %v16_v3 = vld [vmem:[%s199_s0] sm:$0x3] }
   0x3   :  { %124 = vmatprep.subr.bf16.mxu0 %v161_v1 }
   0x4   :  { %8 = vsyncpa [#allocation3], 0  ;;  %v17_v4 = vpack.c.bf16 %v16_v3, %v16_v3  ;;  %vm41_vm1 = vcmask 261120   ;;  %v115_v5 = vld [vmem:[%s201_s2] ss:$0 sm:$0xff]  ;;  %s163_s0 = smov [#allocation2]  }
   0x5   :  { %s107_s1 = sshll.u32 %s163_s0, 4  ;;  %vm99_vm3 = vcmask 123904   ;;  %s108_s1 = int_to_ptr.vmem [resolvable:$true] %s107_s1 }
   0x6   :  { %125 = vmatpush3.bf16.msra.mxu0 %v134_v2  ;;  %s139_s2 = scalar_lea.vmem %s108_s1, 32  ;;  %p144_p1 = scmp.lt.s32.totalorder %s108_s1, %s108_s1 }
   0x7   :  { %p140_p0 = scmp.ne.s32.totalorder %s108_s1, %s139_s2  ;;  %p145_p2 = scmp.lt.s32.totalorder %s139_s2, %s139_s2 }
   0x9   :  { %127 = vmatmul.mubr.msk.bf16.vlgmr.msra.gmra.mxu0 %vm41_vm1, %v17_v4  ;;  %p146_p3 = por %p145_p2, %p144_p1 }
   0xb   :  { %p147_p4 = pnand %p146_p3, %p140_p0 }
  0xc9   :  { %v79_v6 = vpop.f32.mrf.mxu0 }
  0xca   :  { %v80_v7 = vadd.f32 %v115_v5, %v79_v6 }
  0xcb   :  { %v128_v8 = vpop.f32.mrf.mxu0 }
  0xcc   :  { %v86_v9 = vmin.f32 %v80_v7, 20.0  ;;  %vm85_vm4 = vcmp.gt.f32.partialorder %v80_v7, 20.0 }
  0xcd   :  { %v82_v10 = vpop.f32.mrf.mxu0 }
  0xce   :  { %v87_v11 = vmul.f32 1.442695, %v86_v9 }
  0xcf   :  { %v129_v12 = vpop.f32.mrf.mxu0 }
  0xd0   :  { %135 = vpow2.f32 %v87_v11 }
  0xdd   :  { %v136_v13 = vpop.eup %135 }
  0xde   :  { %v89_v14 = vadd.f32 1.0, %v136_v13  ;;  %v92_v15 = vmul.f32 -0.5, %v136_v13  ;;  %v95_v17 = vand.u32 2147483647, %v136_v13 }
  0xe0   :  { %137 = vlog2.f32 %v89_v14  ;;  %v93_v16 = vadd.f32 1.0, %v92_v15  ;;  %vm96_vm2 = vcmp.lt.f32.partialorder %v95_v17, 0.0004427343 }
  0xe2   :  { %v94_v20 = vmul.f32 %v136_v13, %v93_v16 }
  0xed   :  { %v138_v18 = vpop.eup %137 }
  0xee   :  { %v91_v19 = vmul.f32 0.6931472, %v138_v18 }
  0xf0   :  { %v97_v21 = vsel %vm96_vm2, %v94_v20, %v91_v19 }
  0xf1   :  { %v98_v22 = vsel %vm85_vm4, %v80_v7, %v97_v21 }
  0xf2   :  { %100 = vst.msk [vmem:[#allocation2] sm:$0x3] %vm99_vm3, %v98_v22 }
  0xf3   :  { %150 = shalt.err (!%p147_p4)
}
  0xf4   :  { %110 = dma.vmem_to_hbm [thread:$0]  %s108_s1, 32, %s202_s3, [#allocation3]  }
  0xf5   :  { %159 = dma.done.wait [#allocation3], 32  }
  0xf6   :  { %160 = vsyncadd [#allocation3], 4294967264 }
  0xf7   :  { %114 = vsyncpa [#allocation3], 1 }

</bundles_post_ra>
